<compile_context>
chip_gen: v7x
topology: tpu7x:2x2x1
jax: 0.10.0
libtpu: 0.0.40
codegen_flags: <defaults>
</compile_context>

<pallas_src>
import functools

import jax
import jax.numpy as jnp
from jax.experimental import pallas as pl
from jax.experimental.pallas import tpu as pltpu

LANES = 128            # TPU lane width
SUBLANES = 8           # f32 sublanes per vreg
TILE_ROWS_F32 = 4096   # rows per DMA block for 4-byte inputs (2 MiB / buffer)
SUB_ROWS = 1024        # rows per inner compute chunk (bounds live temporaries)
VMEM_LIMIT_BYTES = 32 << 20


def _num_tensorcores() -> int:
    """TensorCores per chip (2 on v7x => split the reduction across them)."""
    try:
        info = pltpu.get_tpu_info()
        for attr in ("num_tensorcores", "tensorcores_per_chip"):
            v = getattr(info, attr, None)
            if isinstance(v, int) and 1 <= v <= 2:
                return v
    except Exception:
        pass
    try:
        if "v7" in jax.devices()[0].device_kind.lower():
            return 2
    except Exception:
        pass
    return 1


def _pick_sub_rows(tile_rows: int) -> int:
    """Largest power-of-two chunk (<= SUB_ROWS, multiple of 8) dividing tile_rows."""
    s = SUB_ROWS
    while s > SUBLANES and tile_rows % s:
        s //= 2
    return s


def _focal_elementwise(x, t, gamma, alpha):
    """Per-element focal loss in float32. gamma/alpha are static Python floats."""
    # binary_cross_entropy_with_logits (reduction='none'), numerically stable:
    #   ce = max(x, 0) - x*t + log1p(exp(-|x|))
    e = jnp.exp(-jnp.abs(x))                      # 1 EUP op, reused below
    ce = jnp.maximum(x, 0.0) - x * t + jnp.log1p(e)
    # sigmoid(x), reusing e.  Approx reciprocal runs on the EUP slot (which has
    # slack here) instead of a multi-pass VALU divide.
    inv = pl.reciprocal(1.0 + e, approx=True)
    p = jnp.where(x >= 0.0, inv, e * inv)
    p_t = p * t + (1.0 - p) * (1.0 - t)
    q = 1.0 - p_t
    g = float(gamma)
    if g == int(g) and 0.0 <= g <= 8.0:           # static: integer gamma -> VPU muls
        gi = int(g)
        mod = jnp.ones_like(q) if gi == 0 else q
        for _ in range(gi - 1):
            mod = mod * q
    else:
        mod = jnp.power(q, g)                     # general case (EUP)
    loss = ce * mod
    if alpha >= 0.0:                              # static branch, matches the module
        alpha_t = alpha * t + (1.0 - alpha) * (1.0 - t)
        loss = alpha_t * loss
    return loss


def _focal_sum_kernel(x_ref, t_ref, out_ref, *, gamma, alpha, rows, tile_rows,
                      sub_rows, n_sub, n_blocks, inner_blocks, needs_mask):
    """One (tile_rows, 128) block -> accumulate into a resident (8,128) block."""
    c = pl.program_id(0)   # reduction split (one per TensorCore on v7x)
    i = pl.program_id(1)   # row-block index within the split

    @pl.when(i == 0)
    def _():
        out_ref[...] = jnp.zeros_like(out_ref)

    blk = c * inner_blocks + i                    # logical (unclamped) block id

    def chunk_partial(j, masked):
        """(8,128) partial sum of sub-chunk j of this block."""
        r0 = pl.multiple_of(j * sub_rows, sub_rows)
        x = x_ref[pl.ds(r0, sub_rows), :].astype(jnp.float32)
        t = t_ref[pl.ds(r0, sub_rows), :].astype(jnp.float32)
        loss = _focal_elementwise(x, t, gamma, alpha)
        if masked:
            # Tail-only: rows at/past `rows` are ragged-block garbage or clamped
            # duplicate reads; zero them with a select (select drops NaNs).
            # Row-count math stays well inside int32.
            limit = rows - blk * tile_rows - j * sub_rows
            rr = jax.lax.broadcasted_iota(jnp.int32, (sub_rows, LANES), 0)
            loss = jnp.where(rr < limit, loss, 0.0)
        return loss.reshape(sub_rows // SUBLANES, SUBLANES, LANES).sum(axis=0)

    def accumulate(masked):
        if n_sub == 1:
            out_ref[...] += chunk_partial(0, masked)[None, :, :]
        else:
            @pl.loop(0, n_sub)
            def _(j):
                out_ref[...] += chunk_partial(j, masked)[None, :, :]

    if needs_mask:
        @pl.when(blk < n_blocks - 1)
        def _():
            accumulate(False)                     # hot path: zero mask work

        @pl.when(blk >= n_blocks - 1)
        def _():
            accumulate(True)                      # tail / clamped steps only
    else:
        accumulate(False)


def _focal_map_kernel(x_ref, t_ref, o_ref, *, gamma, alpha, sub_rows, n_sub):
    """reduction='none' path: elementwise map, streamed in row sub-chunks."""
    def chunk(j):
        r0 = pl.multiple_of(j * sub_rows, sub_rows)
        x = x_ref[pl.ds(r0, sub_rows), :].astype(jnp.float32)
        t = t_ref[pl.ds(r0, sub_rows), :].astype(jnp.float32)
        o_ref[pl.ds(r0, sub_rows), :] = _focal_elementwise(
            x, t, gamma, alpha).astype(o_ref.dtype)

    if n_sub == 1:
        chunk(0)
    else:
        @pl.loop(0, n_sub)
        def _(j):
            chunk(j)


def focal_loss(inp: jax.Array, targ: jax.Array, *, gamma: float = 2.0,
               alpha: float = -1.0, reduction: str = "mean") -> jax.Array:
    """Pallas implementation of FocalLoss.forward (weight=None)."""
    # TODO(synk): per-element `weight` (module default weight=None) not implemented.
    assert inp.shape == targ.shape
    total = int(inp.size)
    if total == 0:
        if reduction == "mean":
            return jnp.float32(jnp.nan)
        if reduction == "sum":
            return jnp.float32(0.0)
        return jnp.zeros(inp.shape, jnp.float32)
    if total >= (1 << 37):
        raise NotImplementedError("row-index math assumes < 2**37 elements")

    # Flatten to a lane-dense [rows, 128] slab in native dtype.  Ragged sizes
    # get a tiny (<1024-element) pad of (x=-1e4, t=0) whose focal loss is
    # exactly 0, so the hot loop never needs an element-level mask.
    chunk = SUBLANES * LANES
    padded = -(-total // chunk) * chunk
    pad = padded - total
    x_flat = jnp.ravel(inp)
    t_flat = jnp.ravel(targ)
    if pad:
        x_flat = jnp.pad(x_flat, (0, pad), constant_values=-1e4)
        t_flat = jnp.pad(t_flat, (0, pad), constant_values=0)
    rows = padded // LANES
    x2 = x_flat.reshape(rows, LANES)
    t2 = t_flat.reshape(rows, LANES)

    # DMA block: ~2 MiB per input buffer per step (scaled so bf16 inputs do not
    # double the grid-step count); inner compute chunks of <=1024 rows.
    itemsize = jnp.dtype(inp.dtype).itemsize
    tile_rows = min(TILE_ROWS_F32 * max(1, 4 // max(itemsize, 1)), rows)
    if tile_rows > SUB_ROWS:
        tile_rows -= tile_rows % SUB_ROWS         # keep inner chunking regular
    sub_rows = _pick_sub_rows(tile_rows)
    n_sub = tile_rows // sub_rows
    n_blocks = pl.cdiv(rows, tile_rows)

    if reduction == "none":
        # Match input dtype for sub-f32 inputs: halves writeback HBM traffic.
        out_dtype = inp.dtype if itemsize < 4 else jnp.float32
        out = pl.pallas_call(
            functools.partial(_focal_map_kernel, gamma=gamma, alpha=alpha,
                              sub_rows=sub_rows, n_sub=n_sub),
            out_shape=jax.ShapeDtypeStruct((rows, LANES), out_dtype),
            grid_spec=pltpu.PrefetchScalarGridSpec(
                num_scalar_prefetch=0,
                grid=(n_blocks,),
                in_specs=[pl.BlockSpec((tile_rows, LANES), lambda i: (i, 0)),
                          pl.BlockSpec((tile_rows, LANES), lambda i: (i, 0))],
                out_specs=pl.BlockSpec((tile_rows, LANES), lambda i: (i, 0)),
            ),
            compiler_params=pltpu.CompilerParams(
                dimension_semantics=("parallel",),
                vmem_limit_bytes=VMEM_LIMIT_BYTES),
        )(x2, t2)
        return out.reshape(-1)[:total].reshape(inp.shape)

    if reduction not in ("mean", "sum"):
        raise ValueError(f"unknown reduction: {reduction!r}")

    # 'mean' / 'sum': per-split partial sums, each held as a resident (8,128)
    # f32 output block (pure VPU adds in the hot loop); one tiny reduce outside.
    n_cores = _num_tensorcores()
    n_split = n_cores if (n_cores > 1 and n_blocks >= n_cores) else 1
    inner = pl.cdiv(n_blocks, n_split)
    ragged = (rows % tile_rows) != 0
    clamped = (n_split * inner) != n_blocks
    needs_mask = ragged or clamped                # static: hot path stays mask-free

    def in_map(c, i):
        # Steps past the last real block re-read block n_blocks-1; the tail
        # mask zeroes their contribution.
        return (jnp.minimum(c * inner + i, n_blocks - 1), 0)

    kernel = functools.partial(
        _focal_sum_kernel, gamma=gamma, alpha=alpha, rows=rows,
        tile_rows=tile_rows, sub_rows=sub_rows, n_sub=n_sub,
        n_blocks=n_blocks, inner_blocks=inner, needs_mask=needs_mask)

    if n_split > 1:
        # Only CORE_PARALLEL actually shards a grid axis across v7x's two TCs.
        sem = (pltpu.CORE_PARALLEL, pltpu.ARBITRARY)
    else:
        sem = (pltpu.ARBITRARY, pltpu.ARBITRARY)

    partials = pl.pallas_call(
        kernel,
        out_shape=jax.ShapeDtypeStruct((n_split, SUBLANES, LANES), jnp.float32),
        grid_spec=pltpu.PrefetchScalarGridSpec(
            num_scalar_prefetch=0,
            grid=(n_split, inner),
            in_specs=[pl.BlockSpec((tile_rows, LANES), in_map),
                      pl.BlockSpec((tile_rows, LANES), in_map)],
            out_specs=pl.BlockSpec((1, SUBLANES, LANES), lambda c, i: (c, 0, 0)),
        ),
        compiler_params=pltpu.CompilerParams(
            dimension_semantics=sem,
            vmem_limit_bytes=VMEM_LIMIT_BYTES),
    )(x2, t2)

    s = jnp.sum(partials)                         # tiny (n_split*8*128) reduce
    if reduction == "mean":
        return s / jnp.float32(total)
    return s


def focal_loss_ref(inp, targ, *, gamma=2.0, alpha=-1.0, reduction="mean"):
    """Pure-JAX reference mirroring the PyTorch module."""
    x = inp.astype(jnp.float32)
    t = targ.astype(jnp.float32)
    ce = jnp.maximum(x, 0.0) - x * t + jnp.log1p(jnp.exp(-jnp.abs(x)))
    p = jax.nn.sigmoid(x)
    p_t = p * t + (1.0 - p) * (1.0 - t)
    loss = ce * (1.0 - p_t) ** gamma
    if alpha >= 0.0:
        alpha_t = alpha * t + (1.0 - alpha) * (1.0 - t)
        loss = alpha_t * loss
    if reduction == "mean":
        return loss.mean()
    if reduction == "sum":
        return loss.sum()
    return loss


if __name__ == "__main__":
    key = jax.random.PRNGKey(0)
    k1, k2, k3, k4, k5, k6 = jax.random.split(key, 6)

    # Tolerances are relaxed because the kernel uses the approximate EUP
    # reciprocal (pl.reciprocal(approx=True)) for sigmoid, per the perf review.
    def check(out, ref, rtol=1e-2, atol=1e-3):
        out = jax.block_until_ready(out)
        ref = jax.block_until_ready(ref)
        assert jnp.allclose(out, ref, rtol=rtol, atol=atol), (out, ref)

    # Small NCHW-style logits / binary targets (module defaults:
    # gamma=2.0, alpha=-1.0, weight=None, reduction='mean').
    x = jax.random.normal(k1, (2, 4, 16, 16), dtype=jnp.float32)
    t = (jax.random.uniform(k2, (2, 4, 16, 16)) > 0.5).astype(jnp.float32)

    check(focal_loss(x, t), focal_loss_ref(x, t))                          # mean
    check(focal_loss(x, t, alpha=0.25), focal_loss_ref(x, t, alpha=0.25))  # alpha path
    check(focal_loss(x, t, reduction="sum"),
          focal_loss_ref(x, t, reduction="sum"))
    check(focal_loss(x, t, reduction="none"),
          focal_loss_ref(x, t, reduction="none"))

    # bf16 inputs pass straight through (cast to f32 inside the kernel only).
    check(focal_loss(x.astype(jnp.bfloat16), t.astype(jnp.bfloat16)),
          focal_loss_ref(x.astype(jnp.bfloat16), t.astype(jnp.bfloat16)),
          rtol=2e-2)

    # Ragged size -> wrapper pad with (x=-1e4, t=0) contributes exactly zero.
    xr = jax.random.normal(k3, (2, 3, 15, 17), dtype=jnp.float32)
    tr = (jax.random.uniform(k4, (2, 3, 15, 17)) > 0.5).astype(jnp.float32)
    check(focal_loss(xr, tr), focal_loss_ref(xr, tr))
    check(focal_loss(xr, tr, reduction="none"),
          focal_loss_ref(xr, tr, reduction="none"))

    # Larger case: multiple row-blocks, ragged last block -> exercises the
    # mask-free hot path plus the gated tail-mask path (rows=5136, tile=4096).
    xb = jax.random.normal(k5, (3, 16, 128, 107), dtype=jnp.float32)
    tb = (jax.random.uniform(k6, (3, 16, 128, 107)) > 0.5).astype(jnp.float32)
    check(focal_loss(xb, tb), focal_loss_ref(xb, tb))
    check(focal_loss(xb, tb, reduction="sum"),
          focal_loss_ref(xb, tb, reduction="sum"))

    print("KERNEL_OK")
</pallas_src>

<mosaic_0001>
module attributes {stable_mosaic.version = 11 : i64} {
  func.func @_focal_sum_kernel(%arg0: i32, %arg1: i32, %arg2: memref<16x128xf32, #tpu.memory_space<vmem>>, %arg3: memref<16x128xf32, #tpu.memory_space<vmem>>, %arg4: memref<1x8x128xf32, #tpu.memory_space<vmem>>) attributes {dimension_semantics = [#tpu.dimension_semantics<arbitrary>, #tpu.dimension_semantics<arbitrary>], iteration_bounds = array<i64: 1, 1>, scalar_prefetch = 0 : i64, scratch_operands = 0 : i64, tpu.core_type = #tpu.core_type<tc>, window_params = [{transform_indices = @transform_0, window_bounds = array<i64: 16, 128>}, {transform_indices = @transform_1, window_bounds = array<i64: 16, 128>}, {transform_indices = @transform_2, window_bounds = array<i64: 1, 8, 128>}]} {
    %c0_i32 = arith.constant 0 : i32
    %0 = arith.cmpi eq, %arg1, %c0_i32 : i32
    %1 = arith.extui %0 : i1 to i32
    %c0_i32_0 = arith.constant 0 : i32
    %2 = arith.cmpi ne, %1, %c0_i32_0 : i32
    scf.if %2 {
      %cst_16 = arith.constant 0.000000e+00 : f32
      %42 = vector.broadcast %cst_16 : f32 to vector<1x8x128xf32>
      %c0_17 = arith.constant 0 : index
      %c0_18 = arith.constant 0 : index
      %c0_19 = arith.constant 0 : index
      %43 = vector.load %arg4[%c0_17, %c0_18, %c0_19] : memref<1x8x128xf32, #tpu.memory_space<vmem>>, vector<1x8x128xf32>
      tpu.vector_store %arg4[%c0_17, %c0_18, %c0_19], %42 {strides = array<i32>} : memref<1x8x128xf32, #tpu.memory_space<vmem>>, vector<1x8x128xf32>,
    } else {
    }
    %c0 = arith.constant 0 : index
    %c0_1 = arith.constant 0 : index
    %c0_2 = arith.constant 0 : index
    %3 = vector.load %arg4[%c0, %c0_1, %c0_2] : memref<1x8x128xf32, #tpu.memory_space<vmem>>, vector<1x8x128xf32>
    %c0_i32_3 = arith.constant 0 : i32
    %4 = tpu.assume_multiple %c0_i32_3, 16 : i32
    %5 = arith.index_cast %4 : i32 to index
    %c0_4 = arith.constant 0 : index
    %6 = vector.load %arg2[%5, %c0_4] : memref<16x128xf32, #tpu.memory_space<vmem>>, vector<16x128xf32>
    %7 = arith.index_cast %4 : i32 to index
    %c0_5 = arith.constant 0 : index
    %8 = vector.load %arg3[%7, %c0_5] : memref<16x128xf32, #tpu.memory_space<vmem>>, vector<16x128xf32>
    %9 = math.absf %6 : vector<16x128xf32>
    %cst = arith.constant 0.000000e+00 : f32
    %10 = vector.broadcast %cst : f32 to vector<16x128xf32>
    %11 = arith.subf %10, %9 : vector<16x128xf32>
    %12 = math.exp %11 : vector<16x128xf32>
    %cst_6 = arith.constant 0.000000e+00 : f32
    %13 = vector.broadcast %cst_6 : f32 to vector<16x128xf32>
    %14 = arith.maximumf %6, %13 : vector<16x128xf32>
    %15 = arith.mulf %6, %8 : vector<16x128xf32>
    %16 = arith.subf %14, %15 : vector<16x128xf32>
    %17 = math.log1p %12 : vector<16x128xf32>
    %18 = arith.addf %16, %17 : vector<16x128xf32>
    %cst_7 = arith.constant 1.000000e+00 : f32
    %19 = vector.broadcast %cst_7 : f32 to vector<16x128xf32>
    %20 = arith.addf %19, %12 : vector<16x128xf32>
    %21 = tpu.reciprocal %20 {approx = true} : vector<16x128xf32> -> vector<16x128xf32>
    %cst_8 = arith.constant 0.000000e+00 : f32
    %22 = vector.broadcast %cst_8 : f32 to vector<16x128xf32>
    %23 = arith.cmpf oge, %6, %22 : vector<16x128xf32>
    %24 = arith.mulf %12, %21 : vector<16x128xf32>
    %25 = arith.select %23, %21, %24 : vector<16x128xi1>, vector<16x128xf32>
    %26 = arith.mulf %25, %8 : vector<16x128xf32>
    %cst_9 = arith.constant 1.000000e+00 : f32
    %27 = vector.broadcast %cst_9 : f32 to vector<16x128xf32>
    %28 = arith.subf %27, %25 : vector<16x128xf32>
    %cst_10 = arith.constant 1.000000e+00 : f32
    %29 = vector.broadcast %cst_10 : f32 to vector<16x128xf32>
    %30 = arith.subf %29, %8 : vector<16x128xf32>
    %31 = arith.mulf %28, %30 : vector<16x128xf32>
    %32 = arith.addf %26, %31 : vector<16x128xf32>
    %cst_11 = arith.constant 1.000000e+00 : f32
    %33 = vector.broadcast %cst_11 : f32 to vector<16x128xf32>
    %34 = arith.subf %33, %32 : vector<16x128xf32>
    %35 = arith.mulf %34, %34 : vector<16x128xf32>
    %36 = arith.mulf %18, %35 : vector<16x128xf32>
    %37 = vector.shape_cast %36 : vector<16x128xf32> to vector<2x8x128xf32>
    %cst_12 = arith.constant dense<0.000000e+00> : vector<8x128xf32>
    %38 = vector.multi_reduction <add>, %37, %cst_12 [0] : vector<2x8x128xf32> to vector<8x128xf32>
    %39 = vector.shape_cast %38 : vector<8x128xf32> to vector<1x8x128xf32>
    %40 = arith.addf %3, %39 : vector<1x8x128xf32>
    %c0_13 = arith.constant 0 : index
    %c0_14 = arith.constant 0 : index
    %c0_15 = arith.constant 0 : index
    %41 = vector.load %arg4[%c0_13, %c0_14, %c0_15] : memref<1x8x128xf32, #tpu.memory_space<vmem>>, vector<1x8x128xf32>
    tpu.vector_store %arg4[%c0_13, %c0_14, %c0_15], %40 {strides = array<i32>} : memref<1x8x128xf32, #tpu.memory_space<vmem>>, vector<1x8x128xf32>,
    return
  }
  func.func @transform_0(%arg0: i32, %arg1: i32) -> (i32, i32) {
    %c1_i32 = arith.constant 1 : i32
    %0 = arith.muli %arg0, %c1_i32 : i32
    %1 = arith.addi %0, %arg1 : i32
    %c0_i32 = arith.constant 0 : i32
    %2 = arith.minsi %1, %c0_i32 : i32
    %c0_i32_0 = arith.constant 0 : i32
    %c0_i32_1 = arith.constant 0 : i32
    return %2, %c0_i32_0 : i32, i32
  }
  func.func @transform_1(%arg0: i32, %arg1: i32) -> (i32, i32) {
    %c1_i32 = arith.constant 1 : i32
    %0 = arith.muli %arg0, %c1_i32 : i32
    %1 = arith.addi %0, %arg1 : i32
    %c0_i32 = arith.constant 0 : i32
    %2 = arith.minsi %1, %c0_i32 : i32
    %c0_i32_0 = arith.constant 0 : i32
    %c0_i32_1 = arith.constant 0 : i32
    return %2, %c0_i32_0 : i32, i32
  }
  func.func @transform_2(%arg0: i32, %arg1: i32) -> (i32, i32, i32) {
    %c0_i32 = arith.constant 0 : i32
    %c0_i32_0 = arith.constant 0 : i32
    %c0_i32_1 = arith.constant 0 : i32
    return %arg0, %c0_i32, %c0_i32_0 : i32, i32, i32
  }
}

</mosaic_0001>

<bundles_post_ra>
// kernel: tpu_custom_call.1
= control target key start
LH: loop header
LB: loop body
LE: loop exit
PB: predicated region body
PF: predicated region fallthrough
CT: control target
= control target key end

     0   :  { %7 = vsyncpa [#allocation3], 0  ;;  %s305_s0 = inlined_call_operand.hbm [shape: f32[16,128], index: 0, kind: input, shape index: {}]   ;;  %s306_s1 = inlined_call_operand.hbm [shape: f32[16,128], index: 1, kind: input, shape index: {}]   ;;  %s307_s2 = inlined_call_operand.hbm [shape: f32[1,8,128], index: 2, kind: output, shape index: {}]  }
   0x1   :  { %8 = vsyncpa [#allocation6], 0 }
   0x2   :  { %9 = vsyncpa [#allocation4], 0  ;;  %s243_s9 = smov [#allocation2]   ;;  %s171_s13 = scalar_lea.hbm %s305_s0, 256 }
   0x3   :  { %s21_s10 = sshll.u32 %s243_s9, 4  ;;  %p172_p0 = scmp.ne.s32.totalorder %s305_s0, %s171_s13  ;;  %s22_s10 = int_to_ptr.vmem [resolvable:$true] %s21_s10 }
   0x4   :  { %p175_p1 = scmp.lt.u32.totalorder %s171_s13, %s305_s0 }
   0x6   :  { %p177_p2 = pnand %p175_p1, %p172_p0 }
   0x8   :  { %180 = shalt.err (!%p177_p2)
}
   0x9   :  { %s181_s18 = scalar_lea.vmem %s22_s10, 256  ;;  %p186_p4 = scmp.lt.s32.totalorder %s22_s10, %s22_s10 }
   0xa   :  { %p182_p3 = scmp.ne.s32.totalorder %s22_s10, %s181_s18  ;;  %p187_p5 = scmp.lt.s32.totalorder %s181_s18, %s181_s18 }
   0xc   :  { %p188_p6 = por %p187_p5, %p186_p4 }
   0xe   :  { %p189_p7 = pnand %p188_p6, %p182_p3 }
  0x10   :  { %192 = shalt.err (!%p189_p7)
}
  0x11   :  { %s244_s19 = smov 128   ;;  %s245_s20 = smov 8  }
  0x12   :  { %27 = dma.hbm_to_vmem [thread:$0]  %s305_s0, 256, %s22_s10, [#allocation3], %s244_s19, %s244_s19, %s245_s20  }
  0x13   :  { %s246_s23 = smov [#allocation5]   ;;  %s193_s27 = scalar_lea.hbm %s306_s1, 256 }
  0x14   :  { %s39_s24 = sshll.u32 %s246_s23, 4  ;;  %p194_p8 = scmp.ne.s32.totalorder %s306_s1, %s193_s27  ;;  %s40_s24 = int_to_ptr.vmem [resolvable:$true] %s39_s24 }
  0x15   :  { %p197_p9 = scmp.lt.u32.totalorder %s193_s27, %s306_s1 }
  0x17   :  { %p199_p10 = pnand %p197_p9, %p194_p8 }
  0x19   :  { %202 = shalt.err (!%p199_p10)
}
  0x1a   :  { %s203_s4 = scalar_lea.vmem %s40_s24, 256  ;;  %p208_p12 = scmp.lt.s32.totalorder %s40_s24, %s40_s24 }
  0x1b   :  { %p204_p11 = scmp.ne.s32.totalorder %s40_s24, %s203_s4  ;;  %p209_p13 = scmp.lt.s32.totalorder %s203_s4, %s203_s4 }
  0x1d   :  { %p210_p0 = por %p209_p13, %p208_p12 }
  0x1f   :  { %p211_p1 = pnand %p210_p0, %p204_p11 }
  0x21   :  { %214 = shalt.err (!%p211_p1)
}
  0x22   :  { %45 = dma.hbm_to_vmem [thread:$0]  %s306_s1, 256, %s40_s24, [#allocation6], %s244_s19, %s244_s19, %s245_s20  }
  0x23   :  { %237 = dma.done.wait [#allocation3], 256  }
  0x24   :  { %238 = vsyncadd [#allocation3], 4294967040 }
  0x25   :  { %239 = dma.done.wait [#allocation6], 256  }
  0x26   :  { %240 = vsyncadd [#allocation6], 4294967040  ;;  %v66_v0 = vld [vmem:[#allocation2] sm:$0xff]  ;;  %v67_v1 = vld [vmem:[#allocation2 + $0x8] sm:$0xff]  ;;  %s247_s1 = smov [#allocation7]  }
  0x27   :  { %v70_v2 = vand.u32 2147483647, %v66_v0  ;;  %v71_v3 = vand.u32 2147483647, %v67_v1  ;;  %v68_v17 = vld [vmem:[#allocation5] sm:$0xff]  ;;  %v69_v18 = vld [vmem:[#allocation5 + $0x8] sm:$0xff] }
  0x28   :  { %v78_v22 = vmax.f32 %v66_v0, 0.0  ;;  %v79_v23 = vmax.f32 %v67_v1, 0.0  ;;  %v80_v24 = vmul.f32 %v68_v17, %v66_v0  ;;  %vm108_vm0 = vcmp.ge.f32.partialorder %v66_v0, 0.0  ;;  %s139_s6 = sshll.u32 %s247_s1, 4  ;;  %s140_s6 = int_to_ptr.vmem [resolvable:$true] %s139_s6 }
  0x29   :  { %v72_v4 = vsub.f32 0.0, %v70_v2  ;;  %v73_v5 = vsub.f32 0.0, %v71_v3  ;;  %v81_v26 = vmul.f32 %v69_v18, %v67_v1  ;;  %vm109_vm1 = vcmp.ge.f32.partialorder %v67_v1, 0.0  ;;  %s215_s7 = scalar_lea.vmem %s140_s6, 128  ;;  %p220_p3 = scmp.lt.s32.totalorder %s140_s6, %s140_s6 }
  0x2a   :  { %v118_v31 = vsub.f32 1.0, %v68_v17  ;;  %v119_v32 = vsub.f32 1.0, %v69_v18  ;;  %v82_v43 = vsub.f32 %v78_v22, %v80_v24  ;;  %p216_p2 = scmp.ne.s32.totalorder %s140_s6, %s215_s7  ;;  %p221_p4 = scmp.lt.s32.totalorder %s215_s7, %s215_s7 }
  0x2b   :  { %v74_v6 = vmul.f32 1.442695, %v72_v4  ;;  %v76_v7 = vmul.f32 1.442695, %v73_v5  ;;  %v83_v45 = vsub.f32 %v79_v23, %v81_v26 }
  0x2c   :  { %p222_p5 = por %p221_p4, %p220_p3 }
  0x2d   :  { %159 = vpow2.f32 %v74_v6 }
  0x2e   :  { %161 = vpow2.f32 %v76_v7  ;;  %p223_p6 = pnand %p222_p5, %p216_p2 }
  0x37   :  { %v160_v8 = vpop.eup %159 }
  0x38   :  { %v162_v9 = vpop.eup %161  ;;  %v84_v10 = vadd.f32 1.0, %v160_v8  ;;  %v87_v12 = vmul.f32 -0.5, %v160_v8  ;;  %v90_v15 = vand.u32 2147483647, %v160_v8 }
  0x39   :  { %v93_v11 = vadd.f32 1.0, %v162_v9  ;;  %v96_v13 = vmul.f32 -0.5, %v162_v9  ;;  %v99_v27 = vand.u32 2147483647, %v162_v9 }
  0x3a   :  { %163 = vlog2.f32 %v84_v10  ;;  %v88_v19 = vadd.f32 1.0, %v87_v12  ;;  %vm287_vm2 = vcmp.lt.f32.partialorder %v90_v15, 0.0004427343 }
  0x3b   :  { %165 = vlog2.f32 %v93_v11  ;;  %v97_v20 = vadd.f32 1.0, %v96_v13  ;;  %vm100_vm3 = vcmp.lt.f32.partialorder %v99_v27, 0.0004427343 }
  0x3c   :  { %167 = vrcp.f32 %v84_v10  ;;  %v89_v34 = vmul.f32 %v160_v8, %v88_v19 }
  0x3d   :  { %169 = vrcp.f32 %v93_v11  ;;  %v98_v35 = vmul.f32 %v162_v9, %v97_v20 }
  0x44   :  { %v164_v14 = vpop.eup %163 }
  0x45   :  { %v166_v16 = vpop.eup %165  ;;  %v86_v33 = vmul.f32 0.6931472, %v164_v14 }
  0x46   :  { %v168_v21 = vpop.eup %167  ;;  %v95_v37 = vmul.f32 0.6931472, %v166_v16 }
  0x47   :  { %v170_v25 = vpop.eup %169  ;;  %v110_v28 = vmul.f32 %v168_v21, %v160_v8  ;;  %v92_v46 = vsel %vm287_vm2, %v89_v34, %v86_v33 }
  0x48   :  { %v111_v30 = vmul.f32 %v170_v25, %v162_v9  ;;  %v101_v48 = vsel %vm100_vm3, %v98_v35, %v95_v37  ;;  %v102_v51 = vadd.f32 %v92_v46, %v82_v43 }
  0x49   :  { %v112_v36 = vsel %vm108_vm0, %v168_v21, %v110_v28  ;;  %v103_v53 = vadd.f32 %v101_v48, %v83_v45 }
  0x4a   :  { %v113_v38 = vsel %vm109_vm1, %v170_v25, %v111_v30  ;;  %v114_v39 = vmul.f32 %v112_v36, %v68_v17  ;;  %v116_v40 = vsub.f32 1.0, %v112_v36 }
  0x4b   :  { %v115_v41 = vmul.f32 %v113_v38, %v69_v18  ;;  %v117_v42 = vsub.f32 1.0, %v113_v38 }
  0x4c   :  { %v120_v44 = vmul.f32 %v118_v31, %v116_v40 }
  0x4d   :  { %v121_v47 = vmul.f32 %v119_v32, %v117_v42 }
  0x4e   :  { %v122_v49 = vadd.f32 %v120_v44, %v114_v39 }
  0x4f   :  { %v123_v50 = vadd.f32 %v121_v47, %v115_v41 }
  0x50   :  { %v124_v52 = vsub.f32 1.0, %v122_v49 }
  0x51   :  { %v125_v54 = vsub.f32 1.0, %v123_v50 }
  0x52   :  { %v126_v55 = vmul.f32 %v124_v52, %v124_v52 }
  0x53   :  { %v127_v56 = vmul.f32 %v125_v54, %v125_v54 }
  0x54   :  { %v128_v57 = vmul.f32 %v126_v55, %v102_v51 }
  0x55   :  { %v129_v58 = vmul.f32 %v127_v56, %v103_v53 }
  0x57   :  { %v130_v59 = vadd.f32 %v129_v58, %v128_v57 }
  0x59   :  { %132 = vst [vmem:[#allocation7] sm:$0xff] %v130_v59 }
  0x5a   :  { %226 = shalt.err (!%p223_p6)
}
  0x5b   :  { %s227_s10 = scalar_lea.hbm %s307_s2, 128 }
  0x5c   :  { %p228_p7 = scmp.ne.s32.totalorder %s307_s2, %s227_s10  ;;  %p231_p8 = scmp.lt.u32.totalorder %s227_s10, %s307_s2 }
  0x5e   :  { %p233_p9 = pnand %p231_p8, %p228_p7 }
  0x60   :  { %236 = shalt.err (!%p233_p9)
}
  0x61   :  { %142 = dma.vmem_to_hbm [thread:$0]  %s140_s6, 128, %s307_s2, [#allocation4]  }
  0x62   :  { %241 = dma.done.wait [#allocation4], 128  }
  0x63   :  { %242 = vsyncadd [#allocation4], 4294967168 }
  0x64   :  { %146 = vsyncpa [#allocation3], 1 }
  0x65   :  { %147 = vsyncpa [#allocation6], 1 }
  0x66   :  { %148 = vsyncpa [#allocation4], 1 }

</bundles_post_ra>
